<compile_context>
chip_gen: v6e
topology: v6e:2x2x1
jax: 0.10.0
libtpu: 0.0.40
codegen_flags: <defaults>
</compile_context>

<pallas_src>
import functools

import jax
import jax.numpy as jnp
from jax import lax
from jax.experimental import pallas as pl
from jax.experimental.pallas import tpu as pltpu

EPS = 1e-5
_SUBLANE = 8
_LANE = 128
_VMEM_LIMIT = 32 * 1024 * 1024   # safe on every generation (v7x physical VMEM = 64 MiB)


def _round_up(n, m):
    return ((n + m - 1) // m) * m


def _pad_axis(a, axis, new_size):
    pad = new_size - a.shape[axis]
    if pad <= 0:
        return a
    widths = [(0, 0)] * a.ndim
    widths[axis] = (0, pad)
    return jnp.pad(a, widths)


def _default_matmul_dtype():
    """bf16 matmul operands on v6e/v7x (256x256 bf16 MXU); f32 on v5e/older (no bf16 VPU)."""
    try:
        kind = jax.devices()[0].device_kind.lower()
    except Exception:
        return jnp.float32
    if ("v6" in kind) or ("v7" in kind):
        return jnp.bfloat16
    return jnp.float32


def _pick_tile(L, target):
    """Lane-axis tile: full L when it fits, else a fixed 128-multiple (remainder masked)."""
    if L <= target:
        return L
    return max((target // _LANE) * _LANE, _LANE)


# ---------------------------------------------------------------------------
# Pass 1: per-(batch, channel) sum / sum-of-squares of g = relu(x) @ w0   (BN stats)
# ---------------------------------------------------------------------------
def _stats_kernel(x_ref, w0t_ref, sum_ref, sq_ref, *, L, TL, mmdt):
    # x_ref: (Cin, TL) one (batch, L-tile) block in NCL layout.  w0t_ref: (HP, Cin).
    # sum_ref / sq_ref: (HP, 1) per-batch accumulators (revisited along the t axis only,
    # so the batch axis can be megacore-parallel on v7x).
    @pl.when(pl.program_id(1) == 0)
    def _init():
        sum_ref[...] = jnp.zeros_like(sum_ref)
        sq_ref[...] = jnp.zeros_like(sq_ref)

    x = x_ref[...]                                        # f32
    xr = jnp.maximum(x, 0.0).astype(mmdt)                 # cast after relu, right before MXU
    g = jnp.dot(w0t_ref[...], xr,
                preferred_element_type=jnp.float32)       # (HP, TL) f32
    if L % TL != 0:                                       # static: mask remainder columns
        col = pl.program_id(1) * TL + lax.broadcasted_iota(jnp.int32, g.shape, 1)
        g = jnp.where(col < L, g, 0.0)
    sum_ref[...] += jnp.sum(g, axis=1, keepdims=True)     # lane reduce -> XLU (idle slot)
    sq_ref[...] += jnp.sum(g * g, axis=1, keepdims=True)


# ---------------------------------------------------------------------------
# Pass 2: recompute g, apply folded per-batch scale/shift, fc_1 + shortcut as two dots
# ---------------------------------------------------------------------------
def _apply_kernel(x_ref, w0t_ref, scale_ref, shift_ref, w1t_ref, wst_ref, b1t_ref,
                  o_ref, *, mmdt):
    x = x_ref[...]                                        # (Cin, TL) f32
    xr = jnp.maximum(x, 0.0).astype(mmdt)
    g = jnp.dot(w0t_ref[...], xr,
                preferred_element_type=jnp.float32)       # (HP, TL) f32
    bn = scale_ref[...] * g + shift_ref[...]              # (HP,1) lane-broadcast, f32
    a = jnp.maximum(bn, 0.0).astype(mmdt)
    # fc_1 + shortcut: two plain dots (no concat scratch, no masked partial store).
    out = (jnp.dot(w1t_ref[...], a, preferred_element_type=jnp.float32)
           + jnp.dot(wst_ref[...], x.astype(mmdt), preferred_element_type=jnp.float32)
           + b1t_ref[...])                                # (OP, TL) + (OP, 1)
    # Remainder columns (if any) hold garbage, but columns are independent and the
    # out-of-bounds part of the block writeback is dropped by Pallas -> no mask needed.
    o_ref[...] = out.astype(o_ref.dtype)                  # lane-dense store along TL


def cres_block_conv1d(x_ncl, c, params, *, matmul_dtype=None, row_tile=1024):
    """x_ncl: (B, size_in, L) float32 (PyTorch NCL layout); c: (B, c_dim) float32.

    matmul_dtype=None auto-selects bf16 on v6e/v7x and f32 on v5e/older; elementwise /
    BN math is always float32.  row_tile is the lane-axis tile (multiple of 128).
    """
    if matmul_dtype is None:
        matmul_dtype = _default_matmul_dtype()
    mmdt = matmul_dtype
    f32 = jnp.float32

    B, size_in, L = x_ncl.shape
    size_h = params["w0"].shape[1]
    size_out = params["w1"].shape[1]

    HP = _round_up(size_h, _SUBLANE)      # hidden channels (sublane axis) -> 8-aligned
    OP = _round_up(size_out, _SUBLANE)    # output channels (sublane axis) -> 8-aligned
    TL = _pick_tile(L, row_tile)
    grid = (B, pl.cdiv(L, TL))

    x = x_ncl.astype(f32)                 # read directly in NCL layout; no transpose/cast pass

    # Channel-major weights (tiny; transposed/padded once in the wrapper).  fc_0's bias b0
    # cancels exactly through training-mode batch norm, so it never enters a kernel.
    w0t = _pad_axis(params["w0"].T, 0, HP).astype(mmdt)                       # (HP, Cin)
    w1t = _pad_axis(_pad_axis(params["w1"].T, 0, OP), 1, HP).astype(mmdt)     # (OP, HP)
    wst = _pad_axis(params["ws"].T, 0, OP).astype(mmdt)                       # (OP, Cin)
    b1t = _pad_axis(params["b1"].T, 0, OP).astype(f32)                        # (OP, 1)

    def rep(shape):  # whole-array block, resident across the whole grid
        return pl.BlockSpec(shape, lambda b, t: (0,) * len(shape))

    x_spec = pl.BlockSpec((None, size_in, TL), lambda b, t: (b, 0, t))
    per_batch_vec = pl.BlockSpec((None, HP, 1), lambda b, t: (b, 0, 0))

    # --- pass 1: BN statistics (per-batch partials -> batch axis megacore-parallel) ------
    sum_b, sq_b = pl.pallas_call(
        functools.partial(_stats_kernel, L=L, TL=TL, mmdt=mmdt),
        out_shape=(jax.ShapeDtypeStruct((B, HP, 1), f32),
                   jax.ShapeDtypeStruct((B, HP, 1), f32)),
        grid_spec=pltpu.PrefetchScalarGridSpec(
            num_scalar_prefetch=0,
            grid=grid,
            in_specs=[x_spec, rep((HP, size_in))],
            out_specs=(per_batch_vec, per_batch_vec),
        ),
        compiler_params=pltpu.CompilerParams(
            dimension_semantics=("parallel", "arbitrary"),
            vmem_limit_bytes=_VMEM_LIMIT),
    )(x, w0t)

    # --- glue: mean/var + hoisted per-batch gamma/beta folded into scale/shift (tiny) ----
    R = B * L
    sum_g = jnp.sum(sum_b[:, :, 0], axis=0)                       # (HP,)
    sq_g = jnp.sum(sq_b[:, :, 0], axis=0)
    mean_g = sum_g / R
    var_g = jnp.maximum(sq_g / R - mean_g * mean_g, 0.0)          # biased var, clamped
    inv = lax.rsqrt(var_g + EPS)
    gamma = _pad_axis(c.astype(f32) @ params["wg"] + params["bg"], 1, HP)   # (B, HP)
    beta = _pad_axis(c.astype(f32) @ params["wb"] + params["bb"], 1, HP)    # (B, HP)
    scale = (gamma * inv)[:, :, None]                             # (B, HP, 1)
    shift = (beta - gamma * (mean_g * inv))[:, :, None]           # b0 folded out analytically

    # --- pass 2: normalize + fc_1 + shortcut, output written directly in NCL layout ------
    out = pl.pallas_call(
        functools.partial(_apply_kernel, mmdt=mmdt),
        out_shape=jax.ShapeDtypeStruct((B, OP, L), f32),
        grid_spec=pltpu.PrefetchScalarGridSpec(
            num_scalar_prefetch=0,
            grid=grid,
            in_specs=[
                x_spec,
                rep((HP, size_in)),          # w0^T
                per_batch_vec,               # scale
                per_batch_vec,               # shift
                rep((OP, HP)),               # w1^T
                rep((OP, size_in)),          # ws^T
                rep((OP, 1)),                # b1
            ],
            out_specs=pl.BlockSpec((None, OP, TL), lambda b, t: (b, 0, t)),
        ),
        compiler_params=pltpu.CompilerParams(
            dimension_semantics=("parallel", "parallel"),   # both TCs on v7x
            vmem_limit_bytes=_VMEM_LIMIT),
    )(x, w0t, scale, shift, w1t, wst, b1t)

    if OP != size_out:
        out = out[:, :size_out, :]
    return out                                                     # (B, size_out, L), NCL


def _reference(x_ncl, c, params, matmul_dtype=jnp.float32):
    """Pure-JAX reference following the PyTorch forward; matmul operands cast to
    matmul_dtype (f32 accumulation) to mirror the kernel's mixed-precision option."""
    f32 = jnp.float32

    def mm(a, w):
        return jnp.dot(a.astype(matmul_dtype), w.astype(matmul_dtype),
                       preferred_element_type=f32)

    relu = lambda t: jnp.maximum(t, 0.0)
    x_blc = jnp.transpose(x_ncl, (0, 2, 1))                        # (B, L, Cin)

    net = mm(relu(x_blc), params["w0"]) + params["b0"][0]          # fc_0 (b0 included)
    mean = jnp.mean(net, axis=(0, 1), keepdims=True)
    var = jnp.mean((net - mean) ** 2, axis=(0, 1), keepdims=True)  # biased
    netn = (net - mean) / jnp.sqrt(var + EPS)
    gamma = (c @ params["wg"] + params["bg"][0])[:, None, :]
    beta = (c @ params["wb"] + params["bb"][0])[:, None, :]
    bn = gamma * netn + beta
    dx = mm(relu(bn), params["w1"]) + params["b1"][0]              # fc_1
    x_s = mm(x_blc, params["ws"])                                  # shortcut
    return jnp.transpose(x_s + dx, (0, 2, 1))                      # (B, size_out, L)


if __name__ == "__main__":
    # small shapes consistent with the module
    B, L = 2, 16
    c_dim, size_in, size_h, size_out = 8, 32, 48, 64   # size_in != size_out -> shortcut

    key = jax.random.PRNGKey(0)
    ks = jax.random.split(key, 13)
    s = 0.1
    params = {
        # stored as (in, out); PyTorch conv weight is (out, in, 1)
        "w0": s * jax.random.normal(ks[0], (size_in, size_h), jnp.float32),
        "b0": s * jax.random.normal(ks[1], (1, size_h), jnp.float32),
        "wg": s * jax.random.normal(ks[2], (c_dim, size_h), jnp.float32),
        "bg": 1.0 + s * jax.random.normal(ks[3], (1, size_h), jnp.float32),
        "wb": s * jax.random.normal(ks[4], (c_dim, size_h), jnp.float32),
        "bb": s * jax.random.normal(ks[5], (1, size_h), jnp.float32),
        "w1": s * jax.random.normal(ks[6], (size_h, size_out), jnp.float32),
        "b1": s * jax.random.normal(ks[7], (1, size_out), jnp.float32),
        "ws": s * jax.random.normal(ks[8], (size_in, size_out), jnp.float32),
    }

    x = jax.random.normal(ks[9], (B, size_in, L), jnp.float32)   # NCL, like PyTorch
    c = jax.random.normal(ks[10], (B, c_dim), jnp.float32)

    # 1) f32 path (parity with the PyTorch module)
    out = jax.block_until_ready(cres_block_conv1d(x, c, params, matmul_dtype=jnp.float32))
    ref = jax.block_until_ready(_reference(x, c, params))
    assert out.shape == (B, size_out, L), out.shape
    err = float(jnp.max(jnp.abs(out - ref)))
    assert err < 1e-2, f"f32 max abs err {err}"

    # 2) multi-tile path with a remainder tile (exercises masking + accumulation), f32
    L2 = 300
    x2 = jax.random.normal(ks[11], (B, size_in, L2), jnp.float32)
    out2 = jax.block_until_ready(
        cres_block_conv1d(x2, c, params, matmul_dtype=jnp.float32, row_tile=128))
    ref2 = jax.block_until_ready(_reference(x2, c, params))
    err2 = float(jnp.max(jnp.abs(out2 - ref2)))
    assert err2 < 1e-2, f"tiled f32 max abs err {err2}"

    # 3) auto dtype (bf16 matmul operands on v6e/v7x, f32 elsewhere); reference mirrors it
    auto_dt = _default_matmul_dtype()
    out3 = jax.block_until_ready(cres_block_conv1d(x, c, params))
    ref3 = jax.block_until_ready(_reference(x, c, params, matmul_dtype=auto_dt))
    tol = 1e-2 if auto_dt == jnp.float32 else 5e-2
    err3 = float(jnp.max(jnp.abs(out3 - ref3)))
    assert err3 < tol, f"{auto_dt} max abs err {err3}"

    print("KERNEL_OK")
</pallas_src>

<mosaic_0001>
module attributes {stable_mosaic.version = 11 : i64} {
  func.func @_stats_kernel(%arg0: i32, %arg1: i32, %arg2: memref<1x32x16xf32, #tpu.memory_space<vmem>>, %arg3: memref<48x32xf32, #tpu.memory_space<vmem>>, %arg4: memref<1x48x1xf32, #tpu.memory_space<vmem>>, %arg5: memref<1x48x1xf32, #tpu.memory_space<vmem>>) attributes {dimension_semantics = [#tpu.dimension_semantics<parallel>, #tpu.dimension_semantics<arbitrary>], iteration_bounds = array<i64: 2, 1>, scalar_prefetch = 0 : i64, scratch_operands = 0 : i64, tpu.core_type = #tpu.core_type<tc>, window_params = [{transform_indices = @transform_0, window_bounds = array<i64: 1, 32, 16>}, {pipeline_mode = #tpu.pipeline_mode<synchronous>, transform_indices = @transform_1, window_bounds = array<i64: 48, 32>}, {transform_indices = @transform_2, window_bounds = array<i64: 1, 48, 1>}, {transform_indices = @transform_3, window_bounds = array<i64: 1, 48, 1>}]} {
    %c0_i32 = arith.constant 0 : i32
    %0 = arith.cmpi eq, %arg1, %c0_i32 : i32
    %1 = arith.extui %0 : i1 to i32
    %c0_i32_0 = arith.constant 0 : i32
    %2 = arith.cmpi ne, %1, %c0_i32_0 : i32
    scf.if %2 {
      %cst_20 = arith.constant 0.000000e+00 : f32
      %26 = vector.broadcast %cst_20 : f32 to vector<48x1xf32>
      %c0_21 = arith.constant 0 : index
      %c0_22 = arith.constant 0 : index
      %c0_23 = arith.constant 0 : index
      %27 = vector.load %arg4[%c0_21, %c0_22, %c0_23] : memref<1x48x1xf32, #tpu.memory_space<vmem>>, vector<1x48x1xf32>
      %28 = vector.shape_cast %27 : vector<1x48x1xf32> to vector<48x1xf32>
      %29 = vector.shape_cast %26 : vector<48x1xf32> to vector<1x48x1xf32>
      tpu.vector_store %arg4[%c0_21, %c0_22, %c0_23], %29 {strides = array<i32>} : memref<1x48x1xf32, #tpu.memory_space<vmem>>, vector<1x48x1xf32>,
      %cst_24 = arith.constant 0.000000e+00 : f32
      %30 = vector.broadcast %cst_24 : f32 to vector<48x1xf32>
      %c0_25 = arith.constant 0 : index
      %c0_26 = arith.constant 0 : index
      %c0_27 = arith.constant 0 : index
      %31 = vector.load %arg5[%c0_25, %c0_26, %c0_27] : memref<1x48x1xf32, #tpu.memory_space<vmem>>, vector<1x48x1xf32>
      %32 = vector.shape_cast %31 : vector<1x48x1xf32> to vector<48x1xf32>
      %33 = vector.shape_cast %30 : vector<48x1xf32> to vector<1x48x1xf32>
      tpu.vector_store %arg5[%c0_25, %c0_26, %c0_27], %33 {strides = array<i32>} : memref<1x48x1xf32, #tpu.memory_space<vmem>>, vector<1x48x1xf32>,
    } else {
    }
    %c0 = arith.constant 0 : index
    %c0_1 = arith.constant 0 : index
    %c0_2 = arith.constant 0 : index
    %3 = vector.load %arg2[%c0, %c0_1, %c0_2] : memref<1x32x16xf32, #tpu.memory_space<vmem>>, vector<1x32x16xf32>
    %4 = vector.shape_cast %3 : vector<1x32x16xf32> to vector<32x16xf32>
    %cst = arith.constant 0.000000e+00 : f32
    %5 = vector.broadcast %cst : f32 to vector<32x16xf32>
    %6 = arith.maximumf %4, %5 : vector<32x16xf32>
    %c0_3 = arith.constant 0 : index
    %c0_4 = arith.constant 0 : index
    %7 = vector.load %arg3[%c0_3, %c0_4] : memref<48x32xf32, #tpu.memory_space<vmem>>, vector<48x32xf32>
    %cst_5 = arith.constant dense<0.000000e+00> : vector<48x16xf32>
    %8 = tpu.matmul %7, %6, %cst_5 {dimension_numbers = #tpu.dot_dimension_numbers<[1], [0], [0], [1], [0, 0, 1, 1], [], []>} : vector<48x32xf32>, vector<32x16xf32>, vector<48x16xf32> -> vector<48x16xf32>
    %c0_6 = arith.constant 0 : index
    %c0_7 = arith.constant 0 : index
    %c0_8 = arith.constant 0 : index
    %9 = vector.load %arg4[%c0_6, %c0_7, %c0_8] : memref<1x48x1xf32, #tpu.memory_space<vmem>>, vector<1x48x1xf32>
    %10 = vector.shape_cast %9 : vector<1x48x1xf32> to vector<48x1xf32>
    %cst_9 = arith.constant dense<0.000000e+00> : vector<48xf32>
    %11 = vector.multi_reduction <add>, %8, %cst_9 [1] : vector<48x16xf32> to vector<48xf32>
    %12 = vector.shape_cast %11 : vector<48xf32> to vector<48x1xf32>
    %13 = arith.addf %10, %12 : vector<48x1xf32>
    %c0_10 = arith.constant 0 : index
    %c0_11 = arith.constant 0 : index
    %c0_12 = arith.constant 0 : index
    %14 = vector.load %arg4[%c0_10, %c0_11, %c0_12] : memref<1x48x1xf32, #tpu.memory_space<vmem>>, vector<1x48x1xf32>
    %15 = vector.shape_cast %14 : vector<1x48x1xf32> to vector<48x1xf32>
    %16 = vector.shape_cast %13 : vector<48x1xf32> to vector<1x48x1xf32>
    tpu.vector_store %arg4[%c0_10, %c0_11, %c0_12], %16 {strides = array<i32>} : memref<1x48x1xf32, #tpu.memory_space<vmem>>, vector<1x48x1xf32>,
    %c0_13 = arith.constant 0 : index
    %c0_14 = arith.constant 0 : index
    %c0_15 = arith.constant 0 : index
    %17 = vector.load %arg5[%c0_13, %c0_14, %c0_15] : memref<1x48x1xf32, #tpu.memory_space<vmem>>, vector<1x48x1xf32>
    %18 = vector.shape_cast %17 : vector<1x48x1xf32> to vector<48x1xf32>
    %19 = arith.mulf %8, %8 : vector<48x16xf32>
    %cst_16 = arith.constant dense<0.000000e+00> : vector<48xf32>
    %20 = vector.multi_reduction <add>, %19, %cst_16 [1] : vector<48x16xf32> to vector<48xf32>
    %21 = vector.shape_cast %20 : vector<48xf32> to vector<48x1xf32>
    %22 = arith.addf %18, %21 : vector<48x1xf32>
    %c0_17 = arith.constant 0 : index
    %c0_18 = arith.constant 0 : index
    %c0_19 = arith.constant 0 : index
    %23 = vector.load %arg5[%c0_17, %c0_18, %c0_19] : memref<1x48x1xf32, #tpu.memory_space<vmem>>, vector<1x48x1xf32>
    %24 = vector.shape_cast %23 : vector<1x48x1xf32> to vector<48x1xf32>
    %25 = vector.shape_cast %22 : vector<48x1xf32> to vector<1x48x1xf32>
    tpu.vector_store %arg5[%c0_17, %c0_18, %c0_19], %25 {strides = array<i32>} : memref<1x48x1xf32, #tpu.memory_space<vmem>>, vector<1x48x1xf32>,
    return
  }
  func.func @transform_0(%arg0: i32, %arg1: i32) -> (i32, i32, i32) {
    %c0_i32 = arith.constant 0 : i32
    %c0_i32_0 = arith.constant 0 : i32
    return %arg0, %c0_i32, %arg1 : i32, i32, i32
  }
  func.func @transform_1(%arg0: i32, %arg1: i32) -> (i32, i32) {
    %c0_i32 = arith.constant 0 : i32
    %c0_i32_0 = arith.constant 0 : i32
    %c0_i32_1 = arith.constant 0 : i32
    return %c0_i32, %c0_i32_0 : i32, i32
  }
  func.func @transform_2(%arg0: i32, %arg1: i32) -> (i32, i32, i32) {
    %c0_i32 = arith.constant 0 : i32
    %c0_i32_0 = arith.constant 0 : i32
    %c0_i32_1 = arith.constant 0 : i32
    return %arg0, %c0_i32, %c0_i32_0 : i32, i32, i32
  }
  func.func @transform_3(%arg0: i32, %arg1: i32) -> (i32, i32, i32) {
    %c0_i32 = arith.constant 0 : i32
    %c0_i32_0 = arith.constant 0 : i32
    %c0_i32_1 = arith.constant 0 : i32
    return %arg0, %c0_i32, %c0_i32_0 : i32, i32, i32
  }
}

</mosaic_0001>

<bundles_post_ra>
// kernel: tpu_custom_call.1
= control target key start
LH: loop header
LB: loop body
LE: loop exit
PB: predicated region body
PF: predicated region fallthrough
CT: control target
= control target key end

     0   :  { %s658_s12 = smov 0   ;;  %s660_s13 = smov 0   ;;  %s798_s0 = inlined_call_operand.vmem [shape: f32[2,32,16], index: 0, kind: input, shape index: {}]   ;;  %s799_s1 = inlined_call_operand.vmem [shape: f32[48,32], index: 1, kind: input, shape index: {}]   ;;  %s800_s2 = inlined_call_operand.vmem [shape: f32[2,48,1], index: 2, kind: output, shape index: {0}]   ;;  %s801_s3 = inlined_call_operand.vmem [shape: f32[2,48,1], index: 3, kind: output, shape index: {1}]  }
   0x1   :  { %s662_s14 = smov 0  }
   0x2 LB: > { %s26_s15 = sadd.s32 1, %s631_s13  ;;  %p538_p0 = scmp.ge.s32.totalorder %s635_s14, 1  ;;  %s635_s14 = sphi %s662_s14, %s14_s14   ;;  %s631_s13 = sphi %s660_s13, %s803_s13   ;;  %s627_s12 = sphi %s658_s12, %s802_s12  }
   0x3   : > { %p28_p1 = scmp.ge.s32.totalorder %s26_s15, 2  ;;  %p157_p2 = scmp.lt.s32.totalorder %s635_s14, 3 }
   0x5   : > { %s805_s15 = smov (%p28_p1, %s26_s15), 0  ;;  %p158_p3 = pnand %p538_p0, %p157_p2 }
   0x6   : > { %p189_p4 = scmp.lt.s32.totalorder (!%p158_p3), %s627_s12, 1 }
   0x7   : > { %161 = sbr.rel (%p158_p3) target bundleno = 381 (0x17d), region = 28 }
   0xc   : > { %v232_v0 = vld [vmem:[%s799_s1] sm:$0xff]  ;;  %vm238_vm0 = vcmask 261120   ;;  %v234_v1 = vld [vmem:[%s799_s1 + $0x10] sm:$0xff]  ;;  %s807_s12 = smov (!%p189_p4, %s627_s12), 1  ;;  %v233_v10 = vld [vmem:[%s799_s1 + $0x8] sm:$0xff]  ;;  %vm211_vm1 = vcmask 7168  }
   0xd   : > { %570 = vmatprep.mubr.msk.f32.mxu0 %vm238_vm0, %v232_v0  ;;  %573 = vmatprep.mubr.msk.f32.mxu1 %vm238_vm0, %v234_v1  ;;  %s551_s20 = sshll.u32 %s807_s12, 5  ;;  %v235_v11 = vld [vmem:[%s799_s1 + $0x18] sm:$0xff]  ;;  %v236_v12 = vld [vmem:[%s799_s1 + $0x20] sm:$0xff]  ;;  %v237_v13 = vld [vmem:[%s799_s1 + $0x28] sm:$0xff]  ;;  %s587_s5 = smul.u32 48, %s807_s12  ;;  %v637_v14 = vmov 0.0  }
   0xe   : > { %s196_s23 = scalar_lea.vmem %s798_s0, %s551_s20  ;;  %vm358_vm2 = vcmask 130048  }
   0xf   : > { %v227_v2 = vld [vmem:[%s196_s23 + $0x18] sm:$0xff]  ;;  %v226_v3 = vld [vmem:[%s196_s23 + $0x10] sm:$0xff]  ;;  %v225_v4 = vld [vmem:[%s196_s23 + $0x8] sm:$0xff]  ;;  %s710_s8 = scalar_lea.vmem %s800_s2, %s587_s5  ;;  %s715_s11 = scalar_lea.vmem %s801_s3, %s587_s5 }
  0x10   : > { %v231_v5 = vmax.f32 %v227_v2, 0.0  ;;  %v230_v6 = vmax.f32 %v226_v3, 0.0  ;;  %v224_v7 = vld [vmem:[%s196_s23] sm:$0xff]  ;;  %v229_v8 = vmax.f32 %v225_v4, 0.0  ;;  %215 = vst.msk [vmem:[%s710_s8 + $0x18] sm:$0xff] %vm211_vm1, %v637_v14  ;;  %212 = vst.msk [vmem:[%s710_s8] sm:$0xff] %vm211_vm1, %v637_v14 }
  0x11   : > { %v228_v9 = vmax.f32 %v224_v7, 0.0  ;;  %213 = vst.msk [vmem:[%s710_s8 + $0x8] sm:$0xff] %vm211_vm1, %v637_v14  ;;  %214 = vst.msk [vmem:[%s710_s8 + $0x10] sm:$0xff] %vm211_vm1, %v637_v14 }
  0x12   : > { %562 = vmatprep.subr.mxu0 %v231_v5  ;;  %579 = vmatprep.subr.mxu1 %v231_v5  ;;  %216 = vst.msk [vmem:[%s710_s8 + $0x20] sm:$0xff] %vm211_vm1, %v637_v14  ;;  %217 = vst.msk [vmem:[%s710_s8 + $0x28] sm:$0xff] %vm211_vm1, %v637_v14 }
  0x13   : > { %563 = vmatpush3.msra.mxu0 %v231_v5  ;;  %583 = vmatpush3.msra.mxu1 %v231_v5  ;;  %218 = vst.msk [vmem:[%s715_s11] sm:$0xff] %vm211_vm1, %v637_v14  ;;  %219 = vst.msk [vmem:[%s715_s11 + $0x8] sm:$0xff] %vm211_vm1, %v637_v14 }
  0x14   : > { %564 = vmatprep.subr.mxu0 %v230_v6  ;;  %580 = vmatprep.subr.mxu1 %v230_v6  ;;  %220 = vst.msk [vmem:[%s715_s11 + $0x10] sm:$0xff] %vm211_vm1, %v637_v14  ;;  %221 = vst.msk [vmem:[%s715_s11 + $0x18] sm:$0xff] %vm211_vm1, %v637_v14 }
  0x15   : > { %565 = vmatpush3.msra.mxu0 %v230_v6  ;;  %584 = vmatpush3.msra.mxu1 %v230_v6  ;;  %222 = vst.msk [vmem:[%s715_s11 + $0x20] sm:$0xff] %vm211_vm1, %v637_v14  ;;  %223 = vst.msk [vmem:[%s715_s11 + $0x28] sm:$0xff] %vm211_vm1, %v637_v14 }
  0x16   : > { %566 = vmatprep.subr.mxu0 %v229_v8  ;;  %581 = vmatprep.subr.mxu1 %v229_v8 }
  0x17   : > { %567 = vmatpush3.msra.mxu0 %v229_v8  ;;  %585 = vmatpush3.msra.mxu1 %v229_v8  ;;  %v355_v39 = vld [vmem:[%s710_s8 + $0x18] sm:$0xff]  ;;  %v352_v46 = vld [vmem:[%s710_s8] sm:$0xff] }
  0x18   : > { %568 = vmatprep.subr.mxu0 %v228_v9  ;;  %582 = vmatprep.subr.mxu1 %v228_v9  ;;  %v353_v40 = vld [vmem:[%s710_s8 + $0x8] sm:$0xff]  ;;  %v354_v45 = vld [vmem:[%s710_s8 + $0x10] sm:$0xff] }
  0x19   : > { %569 = vmatpush3.msra.mxu0 %v228_v9  ;;  %586 = vmatpush3.msra.mxu1 %v228_v9  ;;  %v357_v63 = vld [vmem:[%s710_s8 + $0x28] sm:$0xff]  ;;  %v356_v0 = vld [vmem:[%s710_s8 + $0x20] sm:$0xff] }
  0x1a   : > { %571 = vmatmul.mubr.msk.f32.vlgmr.msra.gmra.mxu0 %vm238_vm0, %v233_v10  ;;  %574 = vmatmul.mubr.msk.f32.vlgmr.msra.gmra.mxu1 %vm238_vm0, %v235_v11  ;;  %v391_v51 = vld [vmem:[%s715_s11 + $0x8] sm:$0xff]  ;;  %v390_v52 = vld [vmem:[%s715_s11] sm:$0xff] }
  0x1b   : > { %576 = vmatprep.mubr.msk.f32.mxu1 %vm238_vm0, %v236_v12  ;;  %v393_v57 = vld [vmem:[%s715_s11 + $0x18] sm:$0xff]  ;;  %v392_v58 = vld [vmem:[%s715_s11 + $0x10] sm:$0xff] }
  0x1c   : > { %v395_v5 = vld [vmem:[%s715_s11 + $0x28] sm:$0xff]  ;;  %v394_v6 = vld [vmem:[%s715_s11 + $0x20] sm:$0xff] }
  0x1e   : > { %577 = vmatmul.mubr.msk.f32.gmra.mxu1 %vm238_vm0, %v237_v13 }
  0xda   : > { %v572_v15 = vpop.f32.mrf.mxu0  ;;  %v575_v16 = vpop.f32.mrf.mxu1 }
  0xdb   : > { %v368_v17 = vsel %vm358_vm2, %v575_v16, 0.0  ;;  %v362_v18 = vsel %vm358_vm2, %v572_v15, 0.0  ;;  %v397_v21 = vmul.f32 %v572_v15, %v572_v15  ;;  %v399_v25 = vmul.f32 %v575_v16, %v575_v16 }
  0xdc   : > { %369 = vadd.xlane.f32.xlu1 %v368_v17  ;;  %v333_v19 = vpop.f32.mrf.mxu1  ;;  %363 = vadd.xlane.f32.xlu0 %v362_v18  ;;  %v323_v20 = vpop.f32.mrf.mxu0 }
  0xdd   : > { %v396_v22 = vmul.f32 %v323_v20, %v323_v20  ;;  %v365_v23 = vsel %vm358_vm2, %v333_v19, 0.0  ;;  %v359_v24 = vsel %vm358_vm2, %v323_v20, 0.0  ;;  %v398_v26 = vmul.f32 %v333_v19, %v333_v19 }
  0xde   : > { %v405_v27 = vsel %vm358_vm2, %v397_v21, 0.0  ;;  %v578_v29 = vpop.f32.mrf.mxu1  ;;  %v411_v30 = vsel %vm358_vm2, %v399_v25, 0.0 }
  0xdf   : > { %v402_v28 = vsel %vm358_vm2, %v396_v22, 0.0  ;;  %v408_v31 = vsel %vm358_vm2, %v398_v26, 0.0  ;;  %v401_v33 = vmul.f32 %v578_v29, %v578_v29  ;;  %v374_v35 = vsel %vm358_vm2, %v578_v29, 0.0 }
  0xe0   : > { %366 = vadd.xlane.f32.xlu1 %v365_v23  ;;  %360 = vadd.xlane.f32.xlu0 %v359_v24  ;;  %v343_v32 = vpop.f32.mrf.mxu1 }
  0xe1   : > { %v400_v34 = vmul.f32 %v343_v32, %v343_v32  ;;  %v371_v36 = vsel %vm358_vm2, %v343_v32, 0.0  ;;  %v417_v37 = vsel %vm358_vm2, %v401_v33, 0.0 }
  0xe3   : > { %v414_v38 = vsel %vm358_vm2, %v400_v34, 0.0 }
  0xe4   : > { %406 = vadd.xlane.f32.xlu1 %v405_v27  ;;  %403 = vadd.xlane.f32.xlu0 %v402_v28 }
  0xe8   : > { %412 = vadd.xlane.f32.xlu1 %v411_v30  ;;  %409 = vadd.xlane.f32.xlu0 %v408_v31 }
  0xec   : > { %375 = vadd.xlane.f32.xlu1 %v374_v35  ;;  %372 = vadd.xlane.f32.xlu0 %v371_v36 }
  0xf0   : > { %418 = vadd.xlane.f32.xlu1 %v417_v37  ;;  %415 = vadd.xlane.f32.xlu0 %v414_v38 }
 0x165   : > { %v370_v41 = vpop.xlane.xlu1 %369  ;;  %v364_v42 = vpop.xlane.xlu0 %363 }
 0x166   : > { %v380_v43 = vadd.f32 %v370_v41, %v355_v39  ;;  %v378_v44 = vadd.f32 %v364_v42, %v353_v40 }
 0x168   : > { %387 = vst.msk [vmem:[%s710_s8 + $0x18] sm:$0xff] %vm211_vm1, %v380_v43  ;;  %385 = vst.msk [vmem:[%s710_s8 + $0x8] sm:$0xff] %vm211_vm1, %v378_v44 }
 0x169   : > { %v367_v47 = vpop.xlane.xlu1 %366  ;;  %v361_v48 = vpop.xlane.xlu0 %360 }
 0x16a   : > { %v379_v49 = vadd.f32 %v367_v47, %v354_v45  ;;  %v377_v50 = vadd.f32 %v361_v48, %v352_v46 }
 0x16c   : > { %386 = vst.msk [vmem:[%s710_s8 + $0x10] sm:$0xff] %vm211_vm1, %v379_v49  ;;  %384 = vst.msk [vmem:[%s710_s8] sm:$0xff] %vm211_vm1, %v377_v50 }
 0x16d   : > { %v407_v53 = vpop.xlane.xlu1 %406  ;;  %v404_v54 = vpop.xlane.xlu0 %403 }
 0x16e   : > { %v421_v55 = vadd.f32 %v407_v53, %v391_v51  ;;  %v420_v56 = vadd.f32 %v404_v54, %v390_v52 }
 0x170   : > { %427 = vst.msk [vmem:[%s715_s11 + $0x8] sm:$0xff] %vm211_vm1, %v421_v55  ;;  %426 = vst.msk [vmem:[%s715_s11] sm:$0xff] %vm211_vm1, %v420_v56 }
 0x171   : > { %v413_v59 = vpop.xlane.xlu1 %412  ;;  %v410_v60 = vpop.xlane.xlu0 %409 }
 0x172   : > { %v423_v61 = vadd.f32 %v413_v59, %v393_v57  ;;  %v422_v62 = vadd.f32 %v410_v60, %v392_v58 }
 0x174   : > { %429 = vst.msk [vmem:[%s715_s11 + $0x18] sm:$0xff] %vm211_vm1, %v423_v61  ;;  %428 = vst.msk [vmem:[%s715_s11 + $0x10] sm:$0xff] %vm211_vm1, %v422_v62 }
 0x175   : > { %v376_v1 = vpop.xlane.xlu1 %375  ;;  %v373_v2 = vpop.xlane.xlu0 %372 }
 0x176   : > { %v382_v3 = vadd.f32 %v376_v1, %v357_v63  ;;  %v381_v4 = vadd.f32 %v373_v2, %v356_v0 }
 0x178   : > { %389 = vst.msk [vmem:[%s710_s8 + $0x28] sm:$0xff] %vm211_vm1, %v382_v3  ;;  %388 = vst.msk [vmem:[%s710_s8 + $0x20] sm:$0xff] %vm211_vm1, %v381_v4 }
 0x179   : > { %v419_v7 = vpop.xlane.xlu1 %418  ;;  %v416_v8 = vpop.xlane.xlu0 %415 }
 0x17a   : > { %v425_v9 = vadd.f32 %v419_v7, %v395_v5  ;;  %v424_v10 = vadd.f32 %v416_v8, %v394_v6 }
 0x17c   : > { %431 = vst.msk [vmem:[%s715_s11 + $0x28] sm:$0xff] %vm211_vm1, %v425_v9  ;;  %430 = vst.msk [vmem:[%s715_s11 + $0x20] sm:$0xff] %vm211_vm1, %v424_v10 }
 0x17d PF: > { %s14_s14 = sadd.s32 1, %s635_s14   ;;  %s802_s12 = smov %s631_s13 }
 0x17e   : > { %p11_p5 = scmp.ge.s32.totalorder %s14_s14, 4   ;;  %s803_s13 = smov %s805_s15 }
 0x180   :  { %13 = sbr.rel (!%p11_p5) target bundleno = 2 (0x2), region = 74 }

</bundles_post_ra>
